<compile_context>
chip_gen: v6e
topology: v6e:2x2x1
jax: 0.10.0
libtpu: 0.0.40
codegen_flags: <defaults>
</compile_context>

<pallas_src>
import functools

import jax
import jax.numpy as jnp
from jax import lax
from jax.experimental import pallas as pl
from jax.experimental.pallas import tpu as pltpu

LEARNER_LR = 0.1
_LANE = 128
_NEG_MASK = -1e9  # additive mask for padded class columns (exp underflows to 0)
# MXU operand dtype: bf16 on v6e/v7x (f32 accumulation). Set to jnp.float32 on
# v5e if exact-f32 MXU operands / full sublane packing is preferred there.
_MXU_DTYPE = jnp.bfloat16


def _round_up(n, m):
    return ((n + m - 1) // m) * m


# ----------------------------------------------------------------------------
# Fused per-task kernel: peeled step 0 + inner SGD loop + query logits/grads
# ----------------------------------------------------------------------------
def _learner_kernel(num_updates,
                    sx_ref, sxT_ref, sy_ref, qx_ref, qxT_ref, qy_ref,
                    w_ref, b_ref,
                    pred_ref, gw_ref, gb_ref,
                    w_pi, b_pi):
    batch = sx_ref.shape[0]
    inv_b = jnp.float32(1.0 / batch)

    # Support tensors are loop-invariant: load + cast to the MXU operand dtype
    # once.  The transposed copy comes pre-materialized from the wrapper, so no
    # per-step XLU transpose sits on the serial SGD chain.
    sx_op = sx_ref[...].astype(_MXU_DTYPE)
    sxT_op = sxT_ref[...].astype(_MXU_DTYPE)
    sy = sy_ref[...]

    def fwd_grads(x_op, xT_op, y, w, b, approx):
        # Forward logits on the MXU (bf16 operands, f32 accumulation).  The
        # padded-class mask is already folded into `b` by the wrapper.
        logits = jnp.dot(x_op, w.astype(_MXU_DTYPE),
                         preferred_element_type=jnp.float32) + b
        m = jnp.max(logits, axis=-1, keepdims=True)
        e = jnp.exp(logits - m)
        s = jnp.sum(e, axis=-1, keepdims=True)
        if approx:
            probs = e * pl.reciprocal(s, approx=True)   # EUP slot, inner loop only
        else:
            probs = e / s                               # exact for returned grads
        dlogits = (probs - y) * inv_b                   # (B, Kp) f32
        gw = jnp.dot(xT_op, dlogits.astype(_MXU_DTYPE),
                     preferred_element_type=jnp.float32)   # (Dp, Kp)
        gb = jnp.sum(dlogits, axis=0, keepdims=True)        # (1, Kp)
        return logits, gw, gb

    if num_updates >= 1:
        # Peeled SGD step 0: gradients against theta directly -> writes theta_pi
        # without the upfront theta -> theta_pi copy (saves a full W read+write).
        w0 = w_ref[...]
        b0 = b_ref[...]
        _, gw0, gb0 = fwd_grads(sx_op, sxT_op, sy, w0, b0, approx=True)
        w_pi[...] = w0 - LEARNER_LR * gw0
        b_pi[...] = b0 - LEARNER_LR * gb0

        def sgd_step(_, carry):
            w_cur = w_pi[...]
            b_cur = b_pi[...]
            _, gw, gb = fwd_grads(sx_op, sxT_op, sy, w_cur, b_cur, approx=True)
            w_pi[...] = w_cur - LEARNER_LR * gw
            b_pi[...] = b_cur - LEARNER_LR * gb
            return carry

        lax.fori_loop(1, num_updates, sgd_step, 0, unroll=True)
        w_q = w_pi[...]
        b_q = b_pi[...]
    else:
        w_q = w_ref[...]
        b_q = b_ref[...]

    # Query pass with adapted theta_pi (exact softmax for the returned grads).
    logits_q, gw_q, gb_q = fwd_grads(
        qx_ref[...].astype(_MXU_DTYPE), qxT_ref[...].astype(_MXU_DTYPE),
        qy_ref[...], w_q, b_q, approx=False)

    pred_ref[...] = logits_q    # padded class cols hold ~-1e9 (never the argmax)
    gw_ref[...] = gw_q
    gb_ref[...] = gb_q


# ----------------------------------------------------------------------------
# VMEM budget (double-buffered blocked operands + shared W + scratch)
# ----------------------------------------------------------------------------
def _vmem_budget_bytes(batch, dp, kp):
    def tile(r, c):
        return _round_up(max(r, 1), 8) * _round_up(max(c, 1), _LANE) * 4

    per_task = (2 * tile(batch, dp)          # sx, qx
                + 2 * tile(dp, batch)        # sx^T, qx^T
                + 2 * tile(batch, kp)        # sy, qy one-hot
                + tile(batch, kp)            # query logits out
                + tile(dp, kp)               # gw out
                + tile(1, kp))               # gb out
    shared = tile(dp, kp) + tile(1, kp)      # theta W, b
    scratch = tile(dp, kp) + tile(1, kp)     # W_pi, b_pi
    est = 2 * (per_task + shared) + scratch + (4 << 20)
    # Never go below the default scoped limit; cap well under physical VMEM.
    return min(max(est, 32 << 20), 100 << 20)


# ----------------------------------------------------------------------------
# Learner wrapper (flatten, lane-dense padding, mask-in-bias, loss/acc)
# ----------------------------------------------------------------------------
@functools.partial(jax.jit, static_argnames=("num_updates",))
def learner_forward(theta, support_x, support_y, query_x, query_y, num_updates):
    """Task-batched Learner.forward -> per-task (loss, grads_pi, acc).

    support_x/query_x: (T, B, ...); support_y/query_y: (T, B).
    A single-task call (T == 1) reproduces the original Learner.forward.
    """
    w, b = theta
    d, k = w.shape
    t, batch = support_y.shape
    dp = _round_up(d, _LANE)
    kp = _round_up(k, _LANE)

    def prep_x(x):
        xf = x.reshape(t, batch, -1).astype(jnp.float32)
        xf = jnp.pad(xf, ((0, 0), (0, 0), (0, dp - d)))     # padded features = 0
        return xf, jnp.swapaxes(xf, 1, 2)                   # + pre-transposed copy

    sx, sxT = prep_x(support_x)
    qx, qxT = prep_x(query_x)
    sy = jax.nn.one_hot(support_y, kp, dtype=jnp.float32)   # padded class cols = 0
    qy = jax.nn.one_hot(query_y, kp, dtype=jnp.float32)
    wp = jnp.pad(w.astype(jnp.float32), ((0, dp - d), (0, kp - k)))
    # Fold the padded-class mask into the bias ONCE; it survives the SGD steps
    # because masked-column probs / grads are exactly 0.
    bp = jnp.pad(b.astype(jnp.float32).reshape(1, k),
                 ((0, 0), (0, kp - k)), constant_values=_NEG_MASK)

    kern = functools.partial(_learner_kernel, num_updates)

    def task(*shape):   # per-task block: squeezed leading task dim
        return pl.BlockSpec((None,) + shape,
                            lambda ti: (ti,) + (0,) * len(shape))

    pred_p, gw_p, gb_p = pl.pallas_call(
        kern,
        grid=(t,),
        out_shape=(
            jax.ShapeDtypeStruct((t, batch, kp), jnp.float32),  # query logits
            jax.ShapeDtypeStruct((t, dp, kp), jnp.float32),     # d loss / d W_pi
            jax.ShapeDtypeStruct((t, 1, kp), jnp.float32),      # d loss / d b_pi
        ),
        in_specs=[
            task(batch, dp),                             # support_x
            task(dp, batch),                             # support_x^T
            task(batch, kp),                             # support one-hot
            task(batch, dp),                             # query_x
            task(dp, batch),                             # query_x^T
            task(batch, kp),                             # query one-hot
            pl.BlockSpec((dp, kp), lambda ti: (0, 0)),   # theta W (shared, resident)
            pl.BlockSpec((1, kp), lambda ti: (0, 0)),    # theta b (shared, masked)
        ],
        out_specs=(
            task(batch, kp),
            task(dp, kp),
            task(1, kp),
        ),
        scratch_shapes=[
            pltpu.VMEM((dp, kp), jnp.float32),           # W_pi
            pltpu.VMEM((1, kp), jnp.float32),            # b_pi
        ],
        compiler_params=pltpu.CompilerParams(
            dimension_semantics=("parallel",),           # independent tasks -> 2 TCs on v7x
            vmem_limit_bytes=_vmem_budget_bytes(batch, dp, kp)),
    )(sx, sxT, sy, qx, qxT, qy, wp, bp)

    logits = pred_p[:, :, :k]                                        # (T, B, K)
    # Query mean cross-entropy from the kernel's (masked) logits.
    logz = jax.nn.logsumexp(logits, axis=-1)                          # (T, B)
    true_logit = jnp.take_along_axis(logits, query_y[..., None], axis=-1)[..., 0]
    loss = jnp.mean(logz - true_logit, axis=-1)                       # (T,)
    indices = jnp.argmax(logits, axis=-1)
    acc = jnp.mean((indices == query_y).astype(jnp.float32), axis=-1)  # (T,)
    grads_pi = (gw_p[:, :d, :k], gb_p[:, :, :k])
    return loss, grads_pi, acc


# ----------------------------------------------------------------------------
# Driver
# ----------------------------------------------------------------------------
if __name__ == "__main__":
    key = jax.random.PRNGKey(0)
    k_sx, k_sy, k_qx, k_qy, k_w = jax.random.split(key, 5)

    meta_tasks = 4     # meta-batch of tasks -> parallel grid axis
    batch = 8          # shots per task (multiple of the f32 sublane count)
    chans = 4          # EEG channels
    samples = 16       # time samples
    n_classes = 4
    feat = 1 * chans * samples
    num_updates = 3

    # NCHW EEG trials per task: (T, B, 1, Chans, Samples)
    support_x = jax.random.normal(
        k_sx, (meta_tasks, batch, 1, chans, samples), jnp.float32)
    support_y = jax.random.randint(
        k_sy, (meta_tasks, batch), 0, n_classes, jnp.int32)
    query_x = jax.random.normal(
        k_qx, (meta_tasks, batch, 1, chans, samples), jnp.float32)
    query_y = jax.random.randint(
        k_qy, (meta_tasks, batch), 0, n_classes, jnp.int32)

    # Deterministic parameter init (theta of self.net)
    w0 = 0.05 * jax.random.normal(k_w, (feat, n_classes), jnp.float32)
    b0 = jnp.zeros((1, n_classes), jnp.float32)

    loss, grads_pi, acc = learner_forward(
        (w0, b0), support_x, support_y, query_x, query_y, num_updates)

    jax.block_until_ready((loss, grads_pi, acc))
    assert bool(jnp.all(jnp.isfinite(loss)))
    assert bool(jnp.all(jnp.isfinite(grads_pi[0])))
    print("KERNEL_OK")
</pallas_src>

<mosaic_0001>
module attributes {stable_mosaic.version = 11 : i64} {
  func.func @_learner_kernel(%arg0: i32, %arg1: memref<1x8x128xf32, #tpu.memory_space<vmem>>, %arg2: memref<1x128x8xf32, #tpu.memory_space<vmem>>, %arg3: memref<1x8x128xf32, #tpu.memory_space<vmem>>, %arg4: memref<1x8x128xf32, #tpu.memory_space<vmem>>, %arg5: memref<1x128x8xf32, #tpu.memory_space<vmem>>, %arg6: memref<1x8x128xf32, #tpu.memory_space<vmem>>, %arg7: memref<128x128xf32, #tpu.memory_space<vmem>>, %arg8: memref<1x128xf32, #tpu.memory_space<vmem>>, %arg9: memref<1x8x128xf32, #tpu.memory_space<vmem>>, %arg10: memref<1x128x128xf32, #tpu.memory_space<vmem>>, %arg11: memref<1x1x128xf32, #tpu.memory_space<vmem>>, %arg12: memref<128x128xf32, #tpu.memory_space<vmem>>, %arg13: memref<1x128xf32, #tpu.memory_space<vmem>>) attributes {dimension_semantics = [#tpu.dimension_semantics<parallel>], iteration_bounds = array<i64: 4>, scalar_prefetch = 0 : i64, scratch_operands = 2 : i64, tpu.core_type = #tpu.core_type<tc>, window_params = [{transform_indices = @transform_0, window_bounds = array<i64: 1, 8, 128>}, {transform_indices = @transform_1, window_bounds = array<i64: 1, 128, 8>}, {transform_indices = @transform_2, window_bounds = array<i64: 1, 8, 128>}, {transform_indices = @transform_3, window_bounds = array<i64: 1, 8, 128>}, {transform_indices = @transform_4, window_bounds = array<i64: 1, 128, 8>}, {transform_indices = @transform_5, window_bounds = array<i64: 1, 8, 128>}, {pipeline_mode = #tpu.pipeline_mode<synchronous>, transform_indices = @transform_6, window_bounds = array<i64: 128, 128>}, {pipeline_mode = #tpu.pipeline_mode<synchronous>, transform_indices = @transform_7, window_bounds = array<i64: 1, 128>}, {transform_indices = @transform_8, window_bounds = array<i64: 1, 8, 128>}, {transform_indices = @transform_9, window_bounds = array<i64: 1, 128, 128>}, {transform_indices = @transform_10, window_bounds = array<i64: 1, 1, 128>}]} {
    %c0 = arith.constant 0 : index
    %c0_0 = arith.constant 0 : index
    %c0_1 = arith.constant 0 : index
    %0 = vector.load %arg1[%c0, %c0_0, %c0_1] : memref<1x8x128xf32, #tpu.memory_space<vmem>>, vector<1x8x128xf32>
    %1 = vector.shape_cast %0 : vector<1x8x128xf32> to vector<8x128xf32>
    %2 = arith.truncf %1 : vector<8x128xf32> to vector<8x128xbf16>
    %c0_2 = arith.constant 0 : index
    %c0_3 = arith.constant 0 : index
    %c0_4 = arith.constant 0 : index
    %3 = vector.load %arg2[%c0_2, %c0_3, %c0_4] : memref<1x128x8xf32, #tpu.memory_space<vmem>>, vector<1x128x8xf32>
    %4 = vector.shape_cast %3 : vector<1x128x8xf32> to vector<128x8xf32>
    %5 = arith.truncf %4 : vector<128x8xf32> to vector<128x8xbf16>
    %c0_5 = arith.constant 0 : index
    %c0_6 = arith.constant 0 : index
    %c0_7 = arith.constant 0 : index
    %6 = vector.load %arg3[%c0_5, %c0_6, %c0_7] : memref<1x8x128xf32, #tpu.memory_space<vmem>>, vector<1x8x128xf32>
    %7 = vector.shape_cast %6 : vector<1x8x128xf32> to vector<8x128xf32>
    %c0_8 = arith.constant 0 : index
    %c0_9 = arith.constant 0 : index
    %8 = vector.load %arg7[%c0_8, %c0_9] : memref<128x128xf32, #tpu.memory_space<vmem>>, vector<128x128xf32>
    %c0_10 = arith.constant 0 : index
    %c0_11 = arith.constant 0 : index
    %9 = vector.load %arg8[%c0_10, %c0_11] : memref<1x128xf32, #tpu.memory_space<vmem>>, vector<1x128xf32>
    %10 = arith.truncf %8 : vector<128x128xf32> to vector<128x128xbf16>
    %cst = arith.constant dense<0.000000e+00> : vector<8x128xf32>
    %11 = tpu.matmul %2, %10, %cst {dimension_numbers = #tpu.dot_dimension_numbers<[1], [0], [0], [1], [0, 0, 1, 1], [], []>} : vector<8x128xbf16>, vector<128x128xbf16>, vector<8x128xf32> -> vector<8x128xf32>
    %12 = vector.broadcast %9 : vector<1x128xf32> to vector<8x128xf32>
    %13 = arith.addf %11, %12 : vector<8x128xf32>
    %cst_12 = arith.constant dense<0xFF800000> : vector<8xf32>
    %14 = vector.multi_reduction <maximumf>, %13, %cst_12 [1] : vector<8x128xf32> to vector<8xf32>
    %15 = vector.shape_cast %14 : vector<8xf32> to vector<8x1xf32>
    %16 = vector.broadcast %15 : vector<8x1xf32> to vector<8x128xf32>
    %17 = arith.subf %13, %16 : vector<8x128xf32>
    %18 = math.exp %17 : vector<8x128xf32>
    %cst_13 = arith.constant dense<0.000000e+00> : vector<8xf32>
    %19 = vector.multi_reduction <add>, %18, %cst_13 [1] : vector<8x128xf32> to vector<8xf32>
    %20 = vector.shape_cast %19 : vector<8xf32> to vector<8x1xf32>
    %21 = tpu.reciprocal %20 {approx = true} : vector<8x1xf32> -> vector<8x1xf32>
    %22 = vector.broadcast %21 : vector<8x1xf32> to vector<8x128xf32>
    %23 = arith.mulf %18, %22 : vector<8x128xf32>
    %24 = arith.subf %23, %7 : vector<8x128xf32>
    %cst_14 = arith.constant 1.250000e-01 : f32
    %25 = vector.broadcast %cst_14 : f32 to vector<8x128xf32>
    %26 = arith.mulf %24, %25 : vector<8x128xf32>
    %27 = arith.truncf %26 : vector<8x128xf32> to vector<8x128xbf16>
    %cst_15 = arith.constant dense<0.000000e+00> : vector<128x128xf32>
    %28 = tpu.matmul %5, %27, %cst_15 {dimension_numbers = #tpu.dot_dimension_numbers<[1], [0], [0], [1], [0, 0, 1, 1], [], []>} : vector<128x8xbf16>, vector<8x128xbf16>, vector<128x128xf32> -> vector<128x128xf32>
    %cst_16 = arith.constant dense<0.000000e+00> : vector<128xf32>
    %29 = vector.multi_reduction <add>, %26, %cst_16 [0] : vector<8x128xf32> to vector<128xf32>
    %30 = vector.shape_cast %29 : vector<128xf32> to vector<1x128xf32>
    %cst_17 = arith.constant 1.000000e-01 : f32
    %31 = vector.broadcast %cst_17 : f32 to vector<128x128xf32>
    %32 = arith.mulf %31, %28 : vector<128x128xf32>
    %33 = arith.subf %8, %32 : vector<128x128xf32>
    %c0_18 = arith.constant 0 : index
    %c0_19 = arith.constant 0 : index
    %34 = vector.load %arg12[%c0_18, %c0_19] : memref<128x128xf32, #tpu.memory_space<vmem>>, vector<128x128xf32>
    tpu.vector_store %arg12[%c0_18, %c0_19], %33 {strides = array<i32>} : memref<128x128xf32, #tpu.memory_space<vmem>>, vector<128x128xf32>,
    %cst_20 = arith.constant 1.000000e-01 : f32
    %35 = vector.broadcast %cst_20 : f32 to vector<1x128xf32>
    %36 = arith.mulf %35, %30 : vector<1x128xf32>
    %37 = arith.subf %9, %36 : vector<1x128xf32>
    %c0_21 = arith.constant 0 : index
    %c0_22 = arith.constant 0 : index
    %38 = vector.load %arg13[%c0_21, %c0_22] : memref<1x128xf32, #tpu.memory_space<vmem>>, vector<1x128xf32>
    tpu.vector_store %arg13[%c0_21, %c0_22], %37 {strides = array<i32>} : memref<1x128xf32, #tpu.memory_space<vmem>>, vector<1x128xf32>,
    %cst_23 = arith.constant 1.250000e-01 : f32
    %c0_i32 = arith.constant 0 : i32
    %c0_24 = arith.constant 0 : index
    %c0_25 = arith.constant 0 : index
    %39 = vector.load %arg12[%c0_24, %c0_25] : memref<128x128xf32, #tpu.memory_space<vmem>>, vector<128x128xf32>
    %c0_26 = arith.constant 0 : index
    %c0_27 = arith.constant 0 : index
    %40 = vector.load %arg13[%c0_26, %c0_27] : memref<1x128xf32, #tpu.memory_space<vmem>>, vector<1x128xf32>
    %41 = arith.truncf %39 : vector<128x128xf32> to vector<128x128xbf16>
    %cst_28 = arith.constant dense<0.000000e+00> : vector<8x128xf32>
    %42 = tpu.matmul %2, %41, %cst_28 {dimension_numbers = #tpu.dot_dimension_numbers<[1], [0], [0], [1], [0, 0, 1, 1], [], []>} : vector<8x128xbf16>, vector<128x128xbf16>, vector<8x128xf32> -> vector<8x128xf32>
    %43 = vector.broadcast %40 : vector<1x128xf32> to vector<8x128xf32>
    %44 = arith.addf %42, %43 : vector<8x128xf32>
    %cst_29 = arith.constant dense<0xFF800000> : vector<8xf32>
    %45 = vector.multi_reduction <maximumf>, %44, %cst_29 [1] : vector<8x128xf32> to vector<8xf32>
    %46 = vector.shape_cast %45 : vector<8xf32> to vector<8x1xf32>
    %47 = vector.broadcast %46 : vector<8x1xf32> to vector<8x128xf32>
    %48 = arith.subf %44, %47 : vector<8x128xf32>
    %49 = math.exp %48 : vector<8x128xf32>
    %cst_30 = arith.constant dense<0.000000e+00> : vector<8xf32>
    %50 = vector.multi_reduction <add>, %49, %cst_30 [1] : vector<8x128xf32> to vector<8xf32>
    %51 = vector.shape_cast %50 : vector<8xf32> to vector<8x1xf32>
    %52 = tpu.reciprocal %51 {approx = true} : vector<8x1xf32> -> vector<8x1xf32>
    %53 = vector.broadcast %52 : vector<8x1xf32> to vector<8x128xf32>
    %54 = arith.mulf %49, %53 : vector<8x128xf32>
    %55 = arith.subf %54, %7 : vector<8x128xf32>
    %56 = vector.broadcast %cst_23 : f32 to vector<8x128xf32>
    %57 = arith.mulf %55, %56 : vector<8x128xf32>
    %58 = arith.truncf %57 : vector<8x128xf32> to vector<8x128xbf16>
    %cst_31 = arith.constant dense<0.000000e+00> : vector<128x128xf32>
    %59 = tpu.matmul %5, %58, %cst_31 {dimension_numbers = #tpu.dot_dimension_numbers<[1], [0], [0], [1], [0, 0, 1, 1], [], []>} : vector<128x8xbf16>, vector<8x128xbf16>, vector<128x128xf32> -> vector<128x128xf32>
    %cst_32 = arith.constant dense<0.000000e+00> : vector<128xf32>
    %60 = vector.multi_reduction <add>, %57, %cst_32 [0] : vector<8x128xf32> to vector<128xf32>
    %61 = vector.shape_cast %60 : vector<128xf32> to vector<1x128xf32>
    %cst_33 = arith.constant 1.000000e-01 : f32
    %62 = vector.broadcast %cst_33 : f32 to vector<128x128xf32>
    %63 = arith.mulf %62, %59 : vector<128x128xf32>
    %64 = arith.subf %39, %63 : vector<128x128xf32>
    %c0_34 = arith.constant 0 : index
    %c0_35 = arith.constant 0 : index
    %65 = vector.load %arg12[%c0_34, %c0_35] : memref<128x128xf32, #tpu.memory_space<vmem>>, vector<128x128xf32>
    tpu.vector_store %arg12[%c0_34, %c0_35], %64 {strides = array<i32>} : memref<128x128xf32, #tpu.memory_space<vmem>>, vector<128x128xf32>,
    %cst_36 = arith.constant 1.000000e-01 : f32
    %66 = vector.broadcast %cst_36 : f32 to vector<1x128xf32>
    %67 = arith.mulf %66, %61 : vector<1x128xf32>
    %68 = arith.subf %40, %67 : vector<1x128xf32>
    %c0_37 = arith.constant 0 : index
    %c0_38 = arith.constant 0 : index
    %69 = vector.load %arg13[%c0_37, %c0_38] : memref<1x128xf32, #tpu.memory_space<vmem>>, vector<1x128xf32>
    tpu.vector_store %arg13[%c0_37, %c0_38], %68 {strides = array<i32>} : memref<1x128xf32, #tpu.memory_space<vmem>>, vector<1x128xf32>,
    %c1_i32 = arith.constant 1 : i32
    %c0_39 = arith.constant 0 : index
    %c0_40 = arith.constant 0 : index
    %70 = vector.load %arg12[%c0_39, %c0_40] : memref<128x128xf32, #tpu.memory_space<vmem>>, vector<128x128xf32>
    %c0_41 = arith.constant 0 : index
    %c0_42 = arith.constant 0 : index
    %71 = vector.load %arg13[%c0_41, %c0_42] : memref<1x128xf32, #tpu.memory_space<vmem>>, vector<1x128xf32>
    %72 = arith.truncf %70 : vector<128x128xf32> to vector<128x128xbf16>
    %cst_43 = arith.constant dense<0.000000e+00> : vector<8x128xf32>
    %73 = tpu.matmul %2, %72, %cst_43 {dimension_numbers = #tpu.dot_dimension_numbers<[1], [0], [0], [1], [0, 0, 1, 1], [], []>} : vector<8x128xbf16>, vector<128x128xbf16>, vector<8x128xf32> -> vector<8x128xf32>
    %74 = vector.broadcast %71 : vector<1x128xf32> to vector<8x128xf32>
    %75 = arith.addf %73, %74 : vector<8x128xf32>
    %cst_44 = arith.constant dense<0xFF800000> : vector<8xf32>
    %76 = vector.multi_reduction <maximumf>, %75, %cst_44 [1] : vector<8x128xf32> to vector<8xf32>
    %77 = vector.shape_cast %76 : vector<8xf32> to vector<8x1xf32>
    %78 = vector.broadcast %77 : vector<8x1xf32> to vector<8x128xf32>
    %79 = arith.subf %75, %78 : vector<8x128xf32>
    %80 = math.exp %79 : vector<8x128xf32>
    %cst_45 = arith.constant dense<0.000000e+00> : vector<8xf32>
    %81 = vector.multi_reduction <add>, %80, %cst_45 [1] : vector<8x128xf32> to vector<8xf32>
    %82 = vector.shape_cast %81 : vector<8xf32> to vector<8x1xf32>
    %83 = tpu.reciprocal %82 {approx = true} : vector<8x1xf32> -> vector<8x1xf32>
    %84 = vector.broadcast %83 : vector<8x1xf32> to vector<8x128xf32>
    %85 = arith.mulf %80, %84 : vector<8x128xf32>
    %86 = arith.subf %85, %7 : vector<8x128xf32>
    %87 = vector.broadcast %cst_23 : f32 to vector<8x128xf32>
    %88 = arith.mulf %86, %87 : vector<8x128xf32>
    %89 = arith.truncf %88 : vector<8x128xf32> to vector<8x128xbf16>
    %cst_46 = arith.constant dense<0.000000e+00> : vector<128x128xf32>
    %90 = tpu.matmul %5, %89, %cst_46 {dimension_numbers = #tpu.dot_dimension_numbers<[1], [0], [0], [1], [0, 0, 1, 1], [], []>} : vector<128x8xbf16>, vector<8x128xbf16>, vector<128x128xf32> -> vector<128x128xf32>
    %cst_47 = arith.constant dense<0.000000e+00> : vector<128xf32>
    %91 = vector.multi_reduction <add>, %88, %cst_47 [0] : vector<8x128xf32> to vector<128xf32>
    %92 = vector.shape_cast %91 : vector<128xf32> to vector<1x128xf32>
    %cst_48 = arith.constant 1.000000e-01 : f32
    %93 = vector.broadcast %cst_48 : f32 to vector<128x128xf32>
    %94 = arith.mulf %93, %90 : vector<128x128xf32>
    %95 = arith.subf %70, %94 : vector<128x128xf32>
    %c0_49 = arith.constant 0 : index
    %c0_50 = arith.constant 0 : index
    %96 = vector.load %arg12[%c0_49, %c0_50] : memref<128x128xf32, #tpu.memory_space<vmem>>, vector<128x128xf32>
    tpu.vector_store %arg12[%c0_49, %c0_50], %95 {strides = array<i32>} : memref<128x128xf32, #tpu.memory_space<vmem>>, vector<128x128xf32>,
    %cst_51 = arith.constant 1.000000e-01 : f32
    %97 = vector.broadcast %cst_51 : f32 to vector<1x128xf32>
    %98 = arith.mulf %97, %92 : vector<1x128xf32>
    %99 = arith.subf %71, %98 : vector<1x128xf32>
    %c0_52 = arith.constant 0 : index
    %c0_53 = arith.constant 0 : index
    %100 = vector.load %arg13[%c0_52, %c0_53] : memref<1x128xf32, #tpu.memory_space<vmem>>, vector<1x128xf32>
    tpu.vector_store %arg13[%c0_52, %c0_53], %99 {strides = array<i32>} : memref<1x128xf32, #tpu.memory_space<vmem>>, vector<1x128xf32>,
    %c0_54 = arith.constant 0 : index
    %c0_55 = arith.constant 0 : index
    %101 = vector.load %arg12[%c0_54, %c0_55] : memref<128x128xf32, #tpu.memory_space<vmem>>, vector<128x128xf32>
    %c0_56 = arith.constant 0 : index
    %c0_57 = arith.constant 0 : index
    %102 = vector.load %arg13[%c0_56, %c0_57] : memref<1x128xf32, #tpu.memory_space<vmem>>, vector<1x128xf32>
    %c0_58 = arith.constant 0 : index
    %c0_59 = arith.constant 0 : index
    %c0_60 = arith.constant 0 : index
    %103 = vector.load %arg4[%c0_58, %c0_59, %c0_60] : memref<1x8x128xf32, #tpu.memory_space<vmem>>, vector<1x8x128xf32>
    %104 = vector.shape_cast %103 : vector<1x8x128xf32> to vector<8x128xf32>
    %105 = arith.truncf %104 : vector<8x128xf32> to vector<8x128xbf16>
    %c0_61 = arith.constant 0 : index
    %c0_62 = arith.constant 0 : index
    %c0_63 = arith.constant 0 : index
    %106 = vector.load %arg5[%c0_61, %c0_62, %c0_63] : memref<1x128x8xf32, #tpu.memory_space<vmem>>, vector<1x128x8xf32>
    %107 = vector.shape_cast %106 : vector<1x128x8xf32> to vector<128x8xf32>
    %108 = arith.truncf %107 : vector<128x8xf32> to vector<128x8xbf16>
    %c0_64 = arith.constant 0 : index
    %c0_65 = arith.constant 0 : index
    %c0_66 = arith.constant 0 : index
    %109 = vector.load %arg6[%c0_64, %c0_65, %c0_66] : memref<1x8x128xf32, #tpu.memory_space<vmem>>, vector<1x8x128xf32>
    %110 = vector.shape_cast %109 : vector<1x8x128xf32> to vector<8x128xf32>
    %111 = arith.truncf %101 : vector<128x128xf32> to vector<128x128xbf16>
    %cst_67 = arith.constant dense<0.000000e+00> : vector<8x128xf32>
    %112 = tpu.matmul %105, %111, %cst_67 {dimension_numbers = #tpu.dot_dimension_numbers<[1], [0], [0], [1], [0, 0, 1, 1], [], []>} : vector<8x128xbf16>, vector<128x128xbf16>, vector<8x128xf32> -> vector<8x128xf32>
    %113 = vector.broadcast %102 : vector<1x128xf32> to vector<8x128xf32>
    %114 = arith.addf %112, %113 : vector<8x128xf32>
    %cst_68 = arith.constant dense<0xFF800000> : vector<8xf32>
    %115 = vector.multi_reduction <maximumf>, %114, %cst_68 [1] : vector<8x128xf32> to vector<8xf32>
    %116 = vector.shape_cast %115 : vector<8xf32> to vector<8x1xf32>
    %117 = vector.broadcast %116 : vector<8x1xf32> to vector<8x128xf32>
    %118 = arith.subf %114, %117 : vector<8x128xf32>
    %119 = math.exp %118 : vector<8x128xf32>
    %cst_69 = arith.constant dense<0.000000e+00> : vector<8xf32>
    %120 = vector.multi_reduction <add>, %119, %cst_69 [1] : vector<8x128xf32> to vector<8xf32>
    %121 = vector.shape_cast %120 : vector<8xf32> to vector<8x1xf32>
    %122 = vector.broadcast %121 : vector<8x1xf32> to vector<8x128xf32>
    %123 = arith.divf %119, %122 : vector<8x128xf32>
    %124 = arith.subf %123, %110 : vector<8x128xf32>
    %cst_70 = arith.constant 1.250000e-01 : f32
    %125 = vector.broadcast %cst_70 : f32 to vector<8x128xf32>
    %126 = arith.mulf %124, %125 : vector<8x128xf32>
    %127 = arith.truncf %126 : vector<8x128xf32> to vector<8x128xbf16>
    %cst_71 = arith.constant dense<0.000000e+00> : vector<128x128xf32>
    %128 = tpu.matmul %108, %127, %cst_71 {dimension_numbers = #tpu.dot_dimension_numbers<[1], [0], [0], [1], [0, 0, 1, 1], [], []>} : vector<128x8xbf16>, vector<8x128xbf16>, vector<128x128xf32> -> vector<128x128xf32>
    %cst_72 = arith.constant dense<0.000000e+00> : vector<128xf32>
    %129 = vector.multi_reduction <add>, %126, %cst_72 [0] : vector<8x128xf32> to vector<128xf32>
    %130 = vector.shape_cast %129 : vector<128xf32> to vector<1x128xf32>
    %c0_73 = arith.constant 0 : index
    %c0_74 = arith.constant 0 : index
    %c0_75 = arith.constant 0 : index
    %131 = vector.load %arg9[%c0_73, %c0_74, %c0_75] : memref<1x8x128xf32, #tpu.memory_space<vmem>>, vector<1x8x128xf32>
    %132 = vector.shape_cast %131 : vector<1x8x128xf32> to vector<8x128xf32>
    %133 = vector.shape_cast %114 : vector<8x128xf32> to vector<1x8x128xf32>
    tpu.vector_store %arg9[%c0_73, %c0_74, %c0_75], %133 {strides = array<i32>} : memref<1x8x128xf32, #tpu.memory_space<vmem>>, vector<1x8x128xf32>,
    %c0_76 = arith.constant 0 : index
    %c0_77 = arith.constant 0 : index
    %c0_78 = arith.constant 0 : index
    %134 = vector.load %arg10[%c0_76, %c0_77, %c0_78] : memref<1x128x128xf32, #tpu.memory_space<vmem>>, vector<1x128x128xf32>
    %135 = vector.shape_cast %134 : vector<1x128x128xf32> to vector<128x128xf32>
    %136 = vector.shape_cast %128 : vector<128x128xf32> to vector<1x128x128xf32>
    tpu.vector_store %arg10[%c0_76, %c0_77, %c0_78], %136 {strides = array<i32>} : memref<1x128x128xf32, #tpu.memory_space<vmem>>, vector<1x128x128xf32>,
    %c0_79 = arith.constant 0 : index
    %c0_80 = arith.constant 0 : index
    %c0_81 = arith.constant 0 : index
    %137 = vector.load %arg11[%c0_79, %c0_80, %c0_81] : memref<1x1x128xf32, #tpu.memory_space<vmem>>, vector<1x1x128xf32>
    %138 = vector.shape_cast %137 : vector<1x1x128xf32> to vector<1x128xf32>
    %139 = vector.shape_cast %130 : vector<1x128xf32> to vector<1x1x128xf32>
    tpu.vector_store %arg11[%c0_79, %c0_80, %c0_81], %139 {strides = array<i32>} : memref<1x1x128xf32, #tpu.memory_space<vmem>>, vector<1x1x128xf32>,
    return
  }
  func.func @transform_0(%arg0: i32) -> (i32, i32, i32) {
    %c0_i32 = arith.constant 0 : i32
    %c0_i32_0 = arith.constant 0 : i32
    %c0_i32_1 = arith.constant 0 : i32
    return %arg0, %c0_i32, %c0_i32_0 : i32, i32, i32
  }
  func.func @transform_1(%arg0: i32) -> (i32, i32, i32) {
    %c0_i32 = arith.constant 0 : i32
    %c0_i32_0 = arith.constant 0 : i32
    %c0_i32_1 = arith.constant 0 : i32
    return %arg0, %c0_i32, %c0_i32_0 : i32, i32, i32
  }
  func.func @transform_2(%arg0: i32) -> (i32, i32, i32) {
    %c0_i32 = arith.constant 0 : i32
    %c0_i32_0 = arith.constant 0 : i32
    %c0_i32_1 = arith.constant 0 : i32
    return %arg0, %c0_i32, %c0_i32_0 : i32, i32, i32
  }
  func.func @transform_3(%arg0: i32) -> (i32, i32, i32) {
    %c0_i32 = arith.constant 0 : i32
    %c0_i32_0 = arith.constant 0 : i32
    %c0_i32_1 = arith.constant 0 : i32
    return %arg0, %c0_i32, %c0_i32_0 : i32, i32, i32
  }
  func.func @transform_4(%arg0: i32) -> (i32, i32, i32) {
    %c0_i32 = arith.constant 0 : i32
    %c0_i32_0 = arith.constant 0 : i32
    %c0_i32_1 = arith.constant 0 : i32
    return %arg0, %c0_i32, %c0_i32_0 : i32, i32, i32
  }
  func.func @transform_5(%arg0: i32) -> (i32, i32, i32) {
    %c0_i32 = arith.constant 0 : i32
    %c0_i32_0 = arith.constant 0 : i32
    %c0_i32_1 = arith.constant 0 : i32
    return %arg0, %c0_i32, %c0_i32_0 : i32, i32, i32
  }
  func.func @transform_6(%arg0: i32) -> (i32, i32) {
    %c0_i32 = arith.constant 0 : i32
    %c0_i32_0 = arith.constant 0 : i32
    %c0_i32_1 = arith.constant 0 : i32
    return %c0_i32, %c0_i32_0 : i32, i32
  }
  func.func @transform_7(%arg0: i32) -> (i32, i32) {
    %c0_i32 = arith.constant 0 : i32
    %c0_i32_0 = arith.constant 0 : i32
    %c0_i32_1 = arith.constant 0 : i32
    return %c0_i32, %c0_i32_0 : i32, i32
  }
  func.func @transform_8(%arg0: i32) -> (i32, i32, i32) {
    %c0_i32 = arith.constant 0 : i32
    %c0_i32_0 = arith.constant 0 : i32
    %c0_i32_1 = arith.constant 0 : i32
    return %arg0, %c0_i32, %c0_i32_0 : i32, i32, i32
  }
  func.func @transform_9(%arg0: i32) -> (i32, i32, i32) {
    %c0_i32 = arith.constant 0 : i32
    %c0_i32_0 = arith.constant 0 : i32
    %c0_i32_1 = arith.constant 0 : i32
    return %arg0, %c0_i32, %c0_i32_0 : i32, i32, i32
  }
  func.func @transform_10(%arg0: i32) -> (i32, i32, i32) {
    %c0_i32 = arith.constant 0 : i32
    %c0_i32_0 = arith.constant 0 : i32
    %c0_i32_1 = arith.constant 0 : i32
    return %arg0, %c0_i32, %c0_i32_0 : i32, i32, i32
  }
}

</mosaic_0001>

<bundles_post_ra>
// kernel: learner_forward.1
= control target key start
LH: loop header
LB: loop body
LE: loop exit
PB: predicated region body
PF: predicated region fallthrough
CT: control target
= control target key end

     0   :  { %s2711_s0 = inlined_call_operand.vmem [shape: f32[4,8,128], index: 0, kind: input, shape index: {}]   ;;  %s2712_s1 = inlined_call_operand.vmem [shape: f32[4,128,8], index: 1, kind: input, shape index: {}]   ;;  %s2713_s2 = inlined_call_operand.vmem [shape: f32[4,8,128], index: 2, kind: input, shape index: {}]   ;;  %s2714_s3 = inlined_call_operand.vmem [shape: f32[4,8,128], index: 3, kind: input, shape index: {}]   ;;  %s2715_s4 = inlined_call_operand.vmem [shape: f32[4,128,8], index: 4, kind: input, shape index: {}]   ;;  %s2716_s5 = inlined_call_operand.vmem [shape: f32[4,8,128], index: 5, kind: input, shape index: {}]   ;;  %s2717_s6 = inlined_call_operand.vmem [shape: f32[128,128], index: 6, kind: input, shape index: {}]   ;;  %s2718_s7 = inlined_call_operand.vmem [shape: f32[1,128], index: 7, kind: input, shape index: {}]   ;;  %s2719_s8 = inlined_call_operand.vmem [shape: f32[4,8,128], index: 8, kind: output, shape index: {0}]   ;;  %s2720_s9 = inlined_call_operand.vmem [shape: f32[4,128,128], index: 9, kind: output, shape index: {1}]   ;;  %s2721_s10 = inlined_call_operand.hbm [shape: f32[4,1,128], index: 10, kind: output, shape index: {2}]  }
   0x1   :  { %2722 = sst [smem:[#allocation7_spill]] %s2711_s0 }
   0x2   :  { %2723 = sst [smem:[#allocation8_spill]] %s2712_s1 }
   0x3   :  { %16 = vsyncpa [#allocation5], 0 }
   0x4   :  { %18 = vsyncpa [#allocation5 + $0x1], 0  ;;  %s2154_s13 = smov 0   ;;  %s2156_s14 = smov 0  }
   0x5   :  { %s2158_s15 = smov 0   ;;  %s2160_s16 = smov 0  }
   0x6 LB: > { %s2175_s17 = sadd.s32 4294967295, %s2094_s16   ;;  %s1692_s18 = sadd.s32 4294967294, %s2094_s16   ;;  %s2094_s16 = sphi %s2160_s16, %s2731_s16   ;;  %s2090_s15 = sphi %s2158_s15, %s2730_s15   ;;  %s2086_s14 = sphi %s2156_s14, %s2729_s14   ;;  %s2082_s13 = sphi %s2154_s13, %s2728_s13  }
   0x7   : > { %s2179_s19 = sadd.s32 1, %s2094_s16   ;;  %s281_s20 = sadd.s32 1, %s2090_s15 }
   0x8   : > { %s278_s21 = ssub.s32 %s2094_s16, %s2179_s19  ;;  %p291_p0 = scmp.ne.s32.totalorder %s2090_s15, %s2086_s14 }
   0x9   : > { %p279_p1 = scmp.eq.s32.totalorder %s278_s21, 0  ;;  %p292_p2 = scmp.eq.s32.totalorder %s2175_s17, 3 }
   0xa   : > { %p297_p3 = scmp.ne.s32.totalorder %s2086_s14, %s2082_s13  ;;  %p298_p4 = scmp.eq.s32.totalorder %s1692_s18, 3 }
   0xb   : > { %s2190_s22 = scalar_select %p279_p1, %s2090_s15, %s281_s20  }
   0xc   : > { %p2192_p5 = por %p292_p2, %p291_p0  ;;  %p2196_p6 = por %p298_p4, %p297_p3 }
   0xd   : > { %p1695_p7 = scmp.ge.s32.totalorder %s2094_s16, 1  ;;  %p366_p8 = scmp.lt.s32.totalorder %s2094_s16, 5 }
   0xf   : > { %p367_p9 = pnand %p1695_p7, %p366_p8 }
  0x10   : > { %p433_p10 = scmp.lt.s32.totalorder (!%p367_p9), %s2175_s17, 3  ;;  %s2726_s0 = sld [smem:[#allocation7_spill]] (!%p367_p9) }
  0x11   : > { %370 = sbr.rel (%p367_p9) target bundleno = 3106 (0xc22), region = 52  ;;  %s2727_s1 = sld [smem:[#allocation8_spill]] (!%p367_p9) }
  0x12   : > { %s1740_s21 = sshll.u32 (!%p367_p9), %s2175_s17, 4 }
  0x16   : > { %v2205_v0 = vld [vmem:[%s2717_s6 + $0x70] sm:$0xff]  ;;  %v2210_v1 = vld [vmem:[%s2717_s6 + $0x78] sm:$0xff]  ;;  %v2215_v2 = vld [vmem:[%s2717_s6 + $0x60] sm:$0xff]  ;;  %v2096_v3 = vmov 0.0   ;;  %vm2097_vm0 = vmmov 0   ;;  %s2281_s27 = scalar_select %p433_p10, %s2175_s17, 3  ;;  %v522_v27 = vlaneseq }
  0x17   : > { %1818 = vmatprep.subr.bf16.mxu0 %v2096_v3  ;;  %v520_v4 = vpack.c.bf16 %v2210_v1, %v2205_v0  ;;  %v2223_v5 = vld [vmem:[%s2717_s6 + $0x68] sm:$0xff]  ;;  %1834 = vmatprep.mubr.msk.bf16.mxu0 %vm2097_vm0, %v2096_v3  ;;  %v2233_v7 = vld [vmem:[%s2717_s6 + $0x50] sm:$0xff]  ;;  %v2238_v8 = vld [vmem:[%s2717_s6 + $0x58] sm:$0xff]  ;;  %vm579_vm1 = vcmask 64512   ;;  %vm604_vm2 = vcmask 1043456  }
  0x18   : > { %v519_v6 = vpack.c.bf16 %v2223_v5, %v2215_v2  ;;  %v518_v9 = vpack.c.bf16 %v2238_v8, %v2233_v7  ;;  %v2246_v10 = vld [vmem:[%s2717_s6 + $0x40] sm:$0xff]  ;;  %v2251_v11 = vld [vmem:[%s2717_s6 + $0x48] sm:$0xff]  ;;  %v2259_v13 = vld [vmem:[%s2717_s6 + $0x30] sm:$0xff]  ;;  %s2297_s12 = sshll.u32 %s2281_s27, 3  ;;  %v523_v28 = vshrl.u32 %v522_v27, 7  ;;  %s2329_s18 = sshll.u32 %s2281_s27, 7 }
  0x19   : > { %1819 = vmatpush3.bf16.msra.mxu0 %v520_v4  ;;  %v517_v12 = vpack.c.bf16 %v2251_v11, %v2246_v10  ;;  %v2264_v14 = vld [vmem:[%s2717_s6 + $0x38] sm:$0xff]  ;;  %v2273_v16 = vld [vmem:[%s2717_s6 + $0x20] sm:$0xff]  ;;  %v2278_v17 = vld [vmem:[%s2717_s6 + $0x28] sm:$0xff]  ;;  %s436_s29 = scalar_lea.vmem %s2726_s0, %s2297_s12  ;;  %s2335_s25 = scalar_lea.vmem %s2727_s1, %s2329_s18 }
  0x1a   : > { %1820 = vmatprep.subr.bf16.mxu0 %v2096_v3  ;;  %v516_v15 = vpack.c.bf16 %v2264_v14, %v2259_v13  ;;  %v515_v18 = vpack.c.bf16 %v2278_v17, %v2273_v16  ;;  %v2289_v19 = vld [vmem:[%s2717_s6 + $0x10] sm:$0xff]  ;;  %v2294_v20 = vld [vmem:[%s2717_s6 + $0x18] sm:$0xff]  ;;  %v2305_v22 = vld [vmem:[%s2717_s6] sm:$0xff]  ;;  %v2322_v29 = vsub.s32 0, %v523_v28  ;;  %s445_s28 = scalar_lea.vmem %s2713_s2, %s2297_s12  ;;  %s449_s11 = scalar_lea.vmem %s2714_s3, %s2297_s12 }
  0x1b   : > { %v514_v21 = vpack.c.bf16 %v2294_v20, %v2289_v19  ;;  %v2310_v23 = vld [vmem:[%s2717_s6 + $0x8] sm:$0xff]  ;;  %v469_v25 = vld [vmem:[%s436_s29] sm:$0xff]  ;;  %v473_v50 = vld [vmem:[%s2335_s25 + $0x10] sm:$0xff]  ;;  %s1526_s29 = scalar_lea.hbm %s2721_s10, %s1740_s21  ;;  %s2098_s0 = smov [#allocation4]  }
  0x1c   : > { %v513_v24 = vpack.c.bf16 %v2310_v23, %v2305_v22  ;;  %v2319_v26 = vpack.c.bf16 %v469_v25, %v469_v25  ;;  %v512_v30 = vld [vmem:[%s2718_s7] sm:$0x1]  ;;  %v472_v42 = vld [vmem:[%s2335_s25 + $0x8] sm:$0xff]  ;;  %v474_v51 = vld [vmem:[%s2335_s25 + $0x18] sm:$0xff]  ;;  %s2038_s1 = sshll.u32 %s2098_s0, 4  ;;  %s2039_s1 = int_to_ptr.vmem [resolvable:$false] %s2038_s1 }
  0x1d   : > { %1821 = vmatpush3.bf16.msra.mxu0 %v519_v6  ;;  %v525_v31 = vrot.slane %v512_v30, %v2322_v29  ;;  %v471_v41 = vld [vmem:[%s2335_s25] sm:$0xff]  ;;  %v476_v55 = vld [vmem:[%s2335_s25 + $0x28] sm:$0xff]  ;;  %v2358_v58 = vpack.c.bf16 %v474_v51, %v473_v50  ;;  %v477_v62 = vld [vmem:[%s2335_s25 + $0x30] sm:$0xff] }
  0x1e   : > { %1822 = vmatprep.subr.bf16.mxu0 %v2096_v3  ;;  %v2339_v43 = vpack.c.bf16 %v472_v42, %v471_v41  ;;  %v2349_v46 = vld [vmem:[%s445_s28] sm:$0xff]  ;;  %v478_v63 = vld [vmem:[%s2335_s25 + $0x38] sm:$0xff]  ;;  %v481_v25 = vld [vmem:[%s2335_s25 + $0x50] sm:$0xff]  ;;  %s2622_s28 = scalar_lea.vmem %s2715_s4, %s2329_s18 }
  0x1f   : > { %v475_v54 = vld [vmem:[%s2335_s25 + $0x20] sm:$0xff]  ;;  %v482_v27 = vld [vmem:[%s2335_s25 + $0x58] sm:$0xff] }
  0x20   : > { %1840 = vmatprep.mubr.msk.bf16.mxu1 %vm579_vm1, %v2339_v43  ;;  %v2360_v59 = vpack.c.bf16 %v476_v55, %v475_v54  ;;  %v479_v6 = vld [vmem:[%s2335_s25 + $0x40] sm:$0xff] }
  0x21   : > { %1823 = vmatpush3.bf16.msra.mxu0 %v518_v9  ;;  %v480_v9 = vld [vmem:[%s2335_s25 + $0x48] sm:$0xff]  ;;  %v483_v28 = vld [vmem:[%s2335_s25 + $0x60] sm:$0xff] }
  0x22   : > { %1824 = vmatprep.subr.bf16.mxu0 %v2096_v3 }
  0x25   : > { %1825 = vmatpush3.bf16.msra.mxu0 %v517_v12 }
  0x26   : > { %1826 = vmatprep.subr.bf16.mxu0 %v2096_v3 }
  0x29   : > { %1827 = vmatpush3.bf16.msra.mxu0 %v516_v15  ;;  %v2371_v15 = vpack.c.bf16 %v478_v63, %v477_v62 }
  0x2a   : > { %1828 = vmatprep.subr.bf16.mxu0 %v2096_v3 }
  0x2d   : > { %1829 = vmatpush3.bf16.msra.mxu0 %v515_v18  ;;  %v2373_v18 = vpack.c.bf16 %v480_v9, %v479_v6 }
  0x2e   : > { %1830 = vmatprep.subr.bf16.mxu0 %v2096_v3 }
  0x31   : > { %1831 = vmatpush3.bf16.msra.mxu0 %v514_v21 }
  0x32   : > { %1832 = vmatprep.subr.bf16.mxu0 %v2096_v3 }
  0x35   : > { %1833 = vmatpush3.bf16.msra.mxu0 %v513_v24 }
  0x38   : > { %1835 = vmatmul.mubr.bf16.vlgmr.msra.gmra.mxu0 %v2319_v26 }
  0x39   : > { %1916 = vmatprep.mubr.msk.bf16.mxu0 %vm579_vm1, %v2339_v43 }
  0xf8   : > { %v561_v32 = vpop.f32.mrf.mxu0 }
  0xf9   : > { %v562_v33 = vadd.f32 %v561_v32, %v525_v31  ;;  %v484_v31 = vld [vmem:[%s2335_s25 + $0x68] sm:$0xff]  ;;  %v2383_v32 = vpack.c.bf16 %v482_v27, %v481_v25 }
  0xfa   : > { %v1836_v34 = vpop.f32.mrf.mxu0 }
  0xfb   : > { %567 = vmax.xlane.f32.xlu0 %v562_v33  ;;  %v486_v34 = vld [vmem:[%s2335_s25 + $0x78] sm:$0xff] }
  0xfc   : > { %v564_v35 = vpop.f32.mrf.mxu0 }
  0xfe   : > { %v1837_v36 = vpop.f32.mrf.mxu0 }
 0x184   : > { %v568_v37 = vpop.xlane.xlu0 %567 }
 0x185   : > { %v569_v38 = vsub.f32 %v562_v33, %v568_v37  ;;  %v2385_v33 = vpack.c.bf16 %v484_v31, %v483_v28 }
 0x187   : > { %v570_v39 = vmul.f32 1.442695, %v569_v38 }
 0x189   : > { %2018 = vpow2.f32 %v570_v39 }
 0x196   : > { %v2019_v40 = vpop.eup %2018 }
 0x197   : > { %572 = vadd.xlane.f32.xlu0 %v2019_v40 }
 0x220   : > { %v573_v44 = vpop.xlane.xlu0 %572 }
 0x221   : > { %2020 = vrcp.f32 %v573_v44 }
 0x22e   : > { %v2021_v45 = vpop.eup %2020 }
 0x22f   : > { %v575_v47 = vmul.f32 %v2021_v45, %v2019_v40 }
 0x231   : > { %v576_v48 = vsub.f32 %v575_v47, %v2349_v46 }
 0x233   : > { %v577_v49 = vmul.f32 0.125, %v576_v48 }
 0x235   : > { %v578_v52 = vpack.c.bf16 %v577_v49, %v577_v49  ;;  %v705_v53 = vrot.slane %v577_v49, 4 }
 0x237   : > { %1972 = vmatprep.subr.msk.bf16.mxu1 %vm604_vm2, %v578_v52  ;;  %v706_v56 = vadd.f32 %v705_v53, %v577_v49  ;;  %v606_v57 = vsel %vm604_vm2, %v578_v52, 0 }
 0x238   : > { %1839 = vmatpush3.bf16.msra.mxu1 %v606_v57 }
 0x239   : > { %v707_v60 = vrot.slane %v706_v56, 2  ;;  %1856 = vmatprep.subr.bf16.mxu1 %v2096_v3 }
 0x23b   : > { %v708_v61 = vadd.f32 %v707_v60, %v706_v56  ;;  %1841 = vmatmul.mubr.msk.bf16.vlgmr.msra.gmra.mxu1 %vm579_vm1, %v2358_v58 }
 0x23c   : > { %1844 = vmatprep.mubr.msk.bf16.mxu1 %vm579_vm1, %v2360_v59 }
 0x23d   : > { %v709_v4 = vrot.slane %v708_v61, 1 }
 0x23f   : > { %v710_v12 = vadd.f32 %v709_v4, %v708_v61 }
 0x241   : > { %v759_v21 = vmul.f32 0.1, %v710_v12 }
 0x243   : > { %v760_v24 = vsub.f32 %v512_v30, %v759_v21  ;;  %1845 = vmatmul.mubr.msk.bf16.gmra.mxu1 %vm579_vm1, %v2371_v15  ;;  %v485_v30 = vld [vmem:[%s2335_s25 + $0x70] sm:$0xff]  ;;  %s462_s25 = scalar_lea.vmem %s2719_s8, %s2297_s12 }
 0x244   : > { %1848 = vmatprep.mubr.msk.bf16.mxu1 %vm579_vm1, %v2373_v18  ;;  %v2393_v35 = vpack.c.bf16 %v486_v34, %v485_v30 }
 0x245   : > { %761 = vst [vmem:[#allocation3] sm:$0x1] %v760_v24 }
 0x24b   : > { %1849 = vmatmul.mubr.msk.bf16.gmra.mxu1 %vm579_vm1, %v2383_v32 }
 0x24c   : > { %1852 = vmatprep.mubr.msk.bf16.mxu1 %vm579_vm1, %v2385_v33 }
 0x253   : > { %1853 = vmatmul.mubr.msk.bf16.gmra.mxu1 %vm579_vm1, %v2393_v35 }
 0x254   : > { %1872 = vmatprep.mubr.msk.bf16.mxu1 %vm2097_vm0, %v2096_v3 }
 0x2fb   : > { %v1842_v36 = vpop.f32.mrf.mxu1 }
 0x2fd   : > { %v642_v37 = vpop.f32.mrf.mxu1 }
 0x2ff   : > { %v1843_v38 = vpop.f32.mrf.mxu1 }
 0x301   : > { %v645_v39 = vpop.f32.mrf.mxu1 }
 0x303   : > { %v1846_v40 = vpop.f32.mrf.mxu1 }
 0x305   : > { %v658_v41 = vpop.f32.mrf.mxu1 }
 0x306   : > { %v715_v34 = vmul.f32 0.1, %v658_v41  ;;  %v712_v41 = vmul.f32 0.1, %v645_v39 }
 0x307   : > { %v1847_v42 = vpop.f32.mrf.mxu1 }
 0x309   : > { %v661_v44 = vpop.f32.mrf.mxu1 }
 0x30a   : > { %v716_v28 = vmul.f32 0.1, %v661_v44 }
 0x30b   : > { %v1850_v45 = vpop.f32.mrf.mxu1 }
 0x30c   : > { %v721_v6 = vmul.f32 0.1, %v1850_v45  ;;  %v711_v45 = vmul.f32 0.1, %v642_v37 }
 0x30d   : > { %v674_v47 = vpop.f32.mrf.mxu1 }
 0x30e   : > { %v2420_v21 = vsub.f32 %v2233_v7, %v721_v6  ;;  %v719_v24 = vmul.f32 0.1, %v674_v47 }
 0x30f   : > { %v1851_v48 = vpop.f32.mrf.mxu1 }
 0x310   : > { %v722_v62 = vmul.f32 0.1, %v1851_v48  ;;  %v2429_v27 = vsub.f32 %v2246_v10, %v719_v24 }
 0x311   : > { %v677_v49 = vpop.f32.mrf.mxu1 }
 0x313   : > { %v1854_v50 = vpop.f32.mrf.mxu1 }
 0x314   : > { %v725_v52 = vmul.f32 0.1, %v1854_v50 }
 0x315   : > { %v690_v51 = vpop.f32.mrf.mxu1 }
 0x316   : > { %v2400_v56 = vsub.f32 %v2205_v0, %v725_v52  ;;  %v723_v57 = vmul.f32 0.1, %v690_v51  ;;  %v2415_v0 = vsub.f32 %v2238_v8, %v722_v62  ;;  %v717_v8 = vmul.f32 0.1, %v1846_v40 }
 0x317   : > { %v1855_v53 = vpop.f32.mrf.mxu1  ;;  %v2444_v40 = vsub.f32 %v2278_v17, %v716_v28  ;;  %v2462_v17 = vsub.f32 %v2310_v23, %v712_v41 }
 0x318   : > { %v726_v54 = vmul.f32 0.1, %v1855_v53  ;;  %v2411_v9 = vsub.f32 %v2215_v2, %v723_v57  ;;  %v784_v2 = vpack.c.bf16 %v2415_v0, %v2420_v21  ;;  %v2438_v30 = vsub.f32 %v2259_v13, %v717_v8 }
 0x319   : > { %v693_v55 = vpop.f32.mrf.mxu1 }
 0x31a   : > { %v2403_v60 = vsub.f32 %v2210_v1, %v726_v54  ;;  %v724_v61 = vmul.f32 0.1, %v693_v55  ;;  %v720_v1 = vmul.f32 0.1, %v677_v49 }
 0x31c   : > { %v786_v63 = vpack.c.bf16 %v2403_v60, %v2400_v56  ;;  %v2408_v4 = vsub.f32 %v2223_v5, %v724_v61  ;;  %v718_v5 = vmul.f32 0.1, %v1847_v42  ;;  %v2426_v25 = vsub.f32 %v2251_v11, %v720_v1 }
 0x31d   : > { %v714_v11 = vmul.f32 0.1, %v1843_v38  ;;  %v2447_v42 = vsub.f32 %v2273_v16, %v715_v34 }
 0x31e   : > { %1857 = vmatpush3.bf16.msra.mxu1 %v786_v63  ;;  %v785_v12 = vpack.c.bf16 %v2408_v4, %v2411_v9  ;;  %v2433_v7 = vsub.f32 %v2264_v14, %v718_v5  ;;  %v783_v31 = vpack.c.bf16 %v2426_v25, %v2429_v27  ;;  %v713_v14 = vmul.f32 0.1, %v1842_v36  ;;  %v778_v36 = vld [vmem:[#allocation3] sm:$0x1] }
 0x31f   : > { %1858 = vmatprep.subr.bf16.mxu1 %v2096_v3  ;;  %v2451_v13 = vsub.f32 %v2294_v20, %v714_v11  ;;  %v781_v38 = vpack.c.bf16 %v2444_v40, %v2447_v42  ;;  %v2465_v20 = vsub.f32 %v2305_v22, %v711_v45  ;;  %v791_v37 = vrot.slane %v778_v36, %v2322_v29 }
 0x320   : > { %v782_v10 = vpack.c.bf16 %v2433_v7, %v2438_v30  ;;  %v2456_v44 = vsub.f32 %v2289_v19, %v713_v14 }
 0x321   : > { %v779_v19 = vpack.c.bf16 %v2462_v17, %v2465_v20 }
 0x322   : > { %1859 = vmatpush3.bf16.msra.mxu1 %v785_v12  ;;  %v780_v16 = vpack.c.bf16 %v2451_v13, %v2456_v44 }
 0x323   : > { %1860 = vmatprep.subr.bf16.mxu1 %v2096_v3 }
 0x326   : > { %1861 = vmatpush3.bf16.msra.mxu1 %v784_v2 }
 0x327   : > { %1862 = vmatprep.subr.bf16.mxu1 %v2096_v3 }
 0x32a   : > { %1863 = vmatpush3.bf16.msra.mxu1 %v783_v31 }
 0x32b   : > { %1864 = vmatprep.subr.bf16.mxu1 %v2096_v3 }
 0x32e   : > { %1865 = vmatpush3.bf16.msra.mxu1 %v782_v10 }
 0x32f   : > { %1866 = vmatprep.subr.bf16.mxu1 %v2096_v3 }
 0x332   : > { %1867 = vmatpush3.bf16.msra.mxu1 %v781_v38 }
 0x333   : > { %1868 = vmatprep.subr.bf16.mxu1 %v2096_v3 }
 0x336   : > { %1869 = vmatpush3.bf16.msra.mxu1 %v780_v16 }
 0x337   : > { %1870 = vmatprep.subr.bf16.mxu1 %v2096_v3 }
 0x33a   : > { %1871 = vmatpush3.bf16.msra.mxu1 %v779_v19 }
 0x33d   : > { %1873 = vmatmul.mubr.bf16.vlgmr.msra.gmra.mxu1 %v2319_v26 }
 0x33e   : > { %1878 = vmatprep.mubr.msk.bf16.mxu1 %vm579_vm1, %v2339_v43 }
 0x3fd   : > { %v827_v23 = vpop.f32.mrf.mxu1 }
 0x3fe   : > { %v828_v39 = vadd.f32 %v827_v23, %v791_v37 }
 0x3ff   : > { %v1874_v47 = vpop.f32.mrf.mxu1 }
 0x400   : > { %833 = vmax.xlane.f32.xlu1 %v828_v39 }
 0x401   : > { %v830_v22 = vpop.f32.mrf.mxu1 }
 0x403   : > { %v1875_v48 = vpop.f32.mrf.mxu1 }
 0x489   : > { %v834_v49 = vpop.xlane.xlu1 %833 }
 0x48a   : > { %v835_v50 = vsub.f32 %v828_v39, %v834_v49 }
 0x48c   : > { %v836_v51 = vmul.f32 1.442695, %v835_v50 }
 0x48e   : > { %2022 = vpow2.f32 %v836_v51 }
 0x49b   : > { %v2023_v52 = vpop.eup %2022 }
 0x49c   : > { %838 = vadd.xlane.f32.xlu1 %v2023_v52 }
 0x525   : > { %v839_v53 = vpop.xlane.xlu1 %838 }
 0x526   : > { %2024 = vrcp.f32 %v839_v53 }
 0x533   : > { %v2025_v54 = vpop.eup %2024 }
 0x534   : > { %v841_v55 = vmul.f32 %v2025_v54, %v2023_v52 }
 0x536   : > { %v842_v43 = vsub.f32 %v841_v55, %v2349_v46 }
 0x538   : > { %v843_v57 = vmul.f32 0.125, %v842_v43 }
 0x53a   : > { %v844_v61 = vpack.c.bf16 %v843_v57, %v843_v57  ;;  %v945_v62 = vrot.slane %v843_v57, 4 }
 0x53c   : > { %1973 = vmatprep.subr.msk.bf16.mxu1 %vm604_vm2, %v844_v61  ;;  %v946_v63 = vadd.f32 %v945_v62, %v843_v57  ;;  %v846_v6 = vsel %vm604_vm2, %v844_v61, 0 }
 0x53d   : > { %1877 = vmatpush3.bf16.msra.mxu1 %v846_v6 }
 0x53e   : > { %v947_v1 = vrot.slane %v946_v63, 2  ;;  %1894 = vmatprep.subr.bf16.mxu1 %v2096_v3 }
 0x540   : > { %v948_v12 = vadd.f32 %v947_v1, %v946_v63  ;;  %1879 = vmatmul.mubr.msk.bf16.vlgmr.msra.gmra.mxu1 %vm579_vm1, %v2358_v58 }
 0x541   : > { %1882 = vmatprep.mubr.msk.bf16.mxu1 %vm579_vm1, %v2360_v59 }
 0x542   : > { %v949_v24 = vrot.slane %v948_v12, 1 }
 0x544   : > { %v950_v5 = vadd.f32 %v949_v24, %v948_v12 }
 0x546   : > { %v999_v2 = vmul.f32 0.1, %v950_v5 }
 0x548   : > { %v1000_v8 = vsub.f32 %v778_v36, %v999_v2  ;;  %1883 = vmatmul.mubr.msk.bf16.gmra.mxu1 %vm579_vm1, %v2371_v15 }
 0x549   : > { %1886 = vmatprep.mubr.msk.bf16.mxu1 %vm579_vm1, %v2373_v18 }
 0x54a   : > { %1001 = vst [vmem:[#allocation3] sm:$0x1] %v1000_v8 }
 0x550   : > { %1887 = vmatmul.mubr.msk.bf16.gmra.mxu1 %vm579_vm1, %v2383_v32 }
 0x551   : > { %1890 = vmatprep.mubr.msk.bf16.mxu1 %vm579_vm1, %v2385_v33 }
 0x558   : > { %1891 = vmatmul.mubr.msk.bf16.gmra.mxu1 %vm579_vm1, %v2393_v35 }
 0x559   : > { %1910 = vmatprep.mubr.msk.bf16.mxu1 %vm2097_vm0, %v2096_v3 }
 0x600   : > { %v1880_v28 = vpop.f32.mrf.mxu1 }
 0x602   : > { %v882_v31 = vpop.f32.mrf.mxu1 }
 0x604   : > { %v1881_v34 = vpop.f32.mrf.mxu1 }
 0x606   : > { %v885_v11 = vpop.f32.mrf.mxu1 }
 0x608   : > { %v1884_v10 = vpop.f32.mrf.mxu1 }
 0x60a   : > { %v898_v14 = vpop.f32.mrf.mxu1 }
 0x60b   : > { %v955_v2 = vmul.f32 0.1, %v898_v14  ;;  %v952_v14 = vmul.f32 0.1, %v885_v11 }
 0x60c   : > { %v1885_v41 = vpop.f32.mrf.mxu1 }
 0x60e   : > { %v901_v38 = vpop.f32.mrf.mxu1 }
 0x60f   : > { %v956_v12 = vmul.f32 0.1, %v901_v38  ;;  %v951_v38 = vmul.f32 0.1, %v882_v31 }
 0x610   : > { %v1888_v45 = vpop.f32.mrf.mxu1 }
 0x611   : > { %v961_v43 = vmul.f32 0.1, %v1888_v45  ;;  %v2539_v8 = vsub.f32 %v2444_v40, %v956_v12 }
 0x612   : > { %v914_v16 = vpop.f32.mrf.mxu1 }
 0x613   : > { %v2515_v62 = vsub.f32 %v2420_v21, %v961_v43  ;;  %v959_v63 = vmul.f32 0.1, %v914_v16 }
 0x614   : > { %v1889_v19 = vpop.f32.mrf.mxu1 }
 0x615   : > { %v962_v53 = vmul.f32 0.1, %v1889_v19  ;;  %v2524_v1 = vsub.f32 %v2429_v27, %v959_v63 }
 0x616   : > { %v917_v36 = vpop.f32.mrf.mxu1 }
 0x618   : > { %v1892_v37 = vpop.f32.mrf.mxu1 }
 0x619   : > { %v965_v39 = vmul.f32 0.1, %v1892_v37 }
 0x61a   : > { %v930_v23 = vpop.f32.mrf.mxu1 }
 0x61b   : > { %v2495_v49 = vsub.f32 %v2400_v56, %v965_v39  ;;  %v963_v50 = vmul.f32 0.1, %v930_v23  ;;  %v2510_v56 = vsub.f32 %v2415_v0, %v962_v53  ;;  %v957_v0 = vmul.f32 0.1, %v1884_v10 }
 0x61c   : > { %v1893_v47 = vpop.f32.mrf.mxu1  ;;  %v2542_v10 = vsub.f32 %v2447_v42, %v955_v2  ;;  %v2557_v42 = vsub.f32 %v2462_v17, %v952_v14 }
 0x61d   : > { %v966_v22 = vmul.f32 0.1, %v1893_v47  ;;  %v2506_v57 = vsub.f32 %v2411_v9, %v963_v50  ;;  %v1024_v9 = vpack.c.bf16 %v2510_v56, %v2515_v62  ;;  %v2533_v5 = vsub.f32 %v2438_v30, %v957_v0 }
 0x61e   : > { %v933_v48 = vpop.f32.mrf.mxu1 }
 0x61f   : > { %v2498_v51 = vsub.f32 %v2403_v60, %v966_v22  ;;  %v964_v52 = vmul.f32 0.1, %v933_v48  ;;  %v960_v60 = vmul.f32 0.1, %v917_v36 }
 0x621   : > { %v1026_v54 = vpack.c.bf16 %v2498_v51, %v2495_v49  ;;  %v2503_v55 = vsub.f32 %v2408_v4, %v964_v52  ;;  %v958_v4 = vmul.f32 0.1, %v1885_v41  ;;  %v2521_v6 = vsub.f32 %v2426_v25, %v960_v60 }
 0x622   : > { %v954_v25 = vmul.f32 0.1, %v1881_v34  ;;  %v1021_v34 = vpack.c.bf16 %v2539_v8, %v2542_v10 }
 0x623   : > { %1895 = vmatpush3.bf16.msra.mxu1 %v1026_v54  ;;  %v1025_v61 = vpack.c.bf16 %v2503_v55, %v2506_v57  ;;  %v2528_v21 = vsub.f32 %v2433_v7, %v958_v4  ;;  %v1023_v24 = vpack.c.bf16 %v2521_v6, %v2524_v1  ;;  %v953_v7 = vmul.f32 0.1, %v1880_v28  ;;  %v1018_v28 = vld [vmem:[#allocation3] sm:$0x1] }
 0x624   : > { %1896 = vmatprep.subr.bf16.mxu1 %v2096_v3  ;;  %v2546_v30 = vsub.f32 %v2451_v13, %v954_v25  ;;  %v2560_v13 = vsub.f32 %v2465_v20, %v951_v38  ;;  %v1031_v31 = vrot.slane %v1018_v28, %v2322_v29 }
 0x625   : > { %v1022_v27 = vpack.c.bf16 %v2528_v21, %v2533_v5  ;;  %v2551_v41 = vsub.f32 %v2456_v44, %v953_v7 }
 0x626   : > { %v1019_v44 = vpack.c.bf16 %v2557_v42, %v2560_v13 }
 0x627   : > { %1897 = vmatpush3.bf16.msra.mxu1 %v1025_v61  ;;  %v1020_v40 = vpack.c.bf16 %v2546_v30, %v2551_v41 }
 0x628   : > { %1898 = vmatprep.subr.bf16.mxu1 %v2096_v3 }
 0x62b   : > { %1899 = vmatpush3.bf16.msra.mxu1 %v1024_v9 }
 0x62c   : > { %1900 = vmatprep.subr.bf16.mxu1 %v2096_v3 }
 0x62f   : > { %1901 = vmatpush3.bf16.msra.mxu1 %v1023_v24 }
 0x630   : > { %1902 = vmatprep.subr.bf16.mxu1 %v2096_v3 }
 0x633   : > { %1903 = vmatpush3.bf16.msra.mxu1 %v1022_v27 }
 0x634   : > { %1904 = vmatprep.subr.bf16.mxu1 %v2096_v3 }
 0x637   : > { %1905 = vmatpush3.bf16.msra.mxu1 %v1021_v34 }
 0x638   : > { %1906 = vmatprep.subr.bf16.mxu1 %v2096_v3 }
 0x63b   : > { %1907 = vmatpush3.bf16.msra.mxu1 %v1020_v40 }
 0x63c   : > { %1908 = vmatprep.subr.bf16.mxu1 %v2096_v3 }
 0x63f   : > { %1909 = vmatpush3.bf16.msra.mxu1 %v1019_v44 }
 0x642   : > { %1911 = vmatmul.mubr.bf16.vlgmr.msra.gmra.mxu1 %v2319_v26 }
 0x702   : > { %v1067_v11 = vpop.f32.mrf.mxu1 }
 0x703   : > { %v1068_v45 = vadd.f32 %v1067_v11, %v1031_v31 }
 0x704   : > { %v1912_v16 = vpop.f32.mrf.mxu1 }
 0x705   : > { %1073 = vmax.xlane.f32.xlu0 %v1068_v45 }
 0x706   : > { %v1070_v17 = vpop.f32.mrf.mxu1 }
 0x708   : > { %v1913_v19 = vpop.f32.mrf.mxu1 }
 0x78e   : > { %v1074_v20 = vpop.xlane.xlu0 %1073 }
 0x78f   : > { %v1075_v36 = vsub.f32 %v1068_v45, %v1074_v20 }
 0x791   : > { %v1076_v37 = vmul.f32 1.442695, %v1075_v36 }
 0x793   : > { %2026 = vpow2.f32 %v1076_v37 }
 0x7a0   : > { %v2027_v23 = vpop.eup %2026 }
 0x7a1   : > { %1078 = vadd.xlane.f32.xlu1 %v2027_v23 }
 0x82a   : > { %v1079_v39 = vpop.xlane.xlu1 %1078 }
 0x82b   : > { %2028 = vrcp.f32 %v1079_v39 }
 0x838   : > { %v2029_v47 = vpop.eup %2028 }
 0x839   : > { %v1081_v22 = vmul.f32 %v2029_v47, %v2027_v23 }
 0x83b   : > { %v1082_v26 = vsub.f32 %v1081_v22, %v2349_v46 }
 0x83d   : > { %v1083_v48 = vmul.f32 0.125, %v1082_v26 }
 0x83f   : > { %v1084_v29 = vpack.c.bf16 %v1083_v48, %v1083_v48  ;;  %v1185_v50 = vrot.slane %v1083_v48, 4 }
 0x841   : > { %1974 = vmatprep.subr.msk.bf16.mxu0 %vm604_vm2, %v1084_v29  ;;  %v1186_v52 = vadd.f32 %v1185_v50, %v1083_v48  ;;  %v1086_v53 = vsel %vm604_vm2, %v1084_v29, 0 }
 0x842   : > { %1915 = vmatpush3.bf16.msra.mxu0 %v1086_v53 }
 0x843   : > { %v1187_v54 = vrot.slane %v1186_v52, 2  ;;  %1932 = vmatprep.subr.bf16.mxu0 %v2096_v3 }
 0x845   : > { %v1188_v43 = vadd.f32 %v1187_v54, %v1186_v52  ;;  %1917 = vmatmul.mubr.msk.bf16.vlgmr.msra.gmra.mxu0 %vm579_vm1, %v2358_v58 }
 0x846   : > { %1920 = vmatprep.mubr.msk.bf16.mxu0 %vm579_vm1, %v2360_v59 }
 0x847   : > { %v1189_v46 = vrot.slane %v1188_v43, 1 }
 0x849   : > { %v1190_v60 = vadd.f32 %v1189_v46, %v1188_v43 }
 0x84b   : > { %v1239_v61 = vmul.f32 0.1, %v1190_v60 }
 0x84d   : > { %v1240_v63 = vsub.f32 %v1018_v28, %v1239_v61  ;;  %1921 = vmatmul.mubr.msk.bf16.gmra.mxu0 %vm579_vm1, %v2371_v15 }
 0x84e   : > { %1924 = vmatprep.mubr.msk.bf16.mxu0 %vm579_vm1, %v2373_v18 }
 0x84f   : > { %1241 = vst [vmem:[#allocation3] sm:$0x1] %v1240_v63 }
 0x855   : > { %1925 = vmatmul.mubr.msk.bf16.gmra.mxu0 %vm579_vm1, %v2383_v32 }
 0x856   : > { %1928 = vmatprep.mubr.msk.bf16.mxu0 %vm579_vm1, %v2385_v33 }
 0x85d   : > { %1929 = vmatmul.mubr.msk.bf16.gmra.mxu0 %vm579_vm1, %v2393_v35 }
 0x85e   : > { %1948 = vmatprep.mubr.msk.bf16.mxu0 %vm2097_vm0, %v2096_v3 }
 0x905   : > { %v1918_v58 = vpop.f32.mrf.mxu0 }
 0x906   : > { %v1193_v50 = vmul.f32 0.1, %v1918_v58 }
 0x907   : > { %v1122_v59 = vpop.f32.mrf.mxu0 }
 0x908   : > { %v1191_v54 = vmul.f32 0.1, %v1122_v59 }
 0x909   : > { %v1919_v4 = vpop.f32.mrf.mxu0 }
 0x90a   : > { %v1194_v48 = vmul.f32 0.1, %v1919_v4  ;;  %v1207_v43 = vsub.f32 %v2560_v13, %v1191_v54 }
 0x90b   : > { %v1125_v15 = vpop.f32.mrf.mxu0 }
 0x90c   : > { %v1192_v52 = vmul.f32 0.1, %v1125_v15 }
 0x90d   : > { %v1922_v9 = vpop.f32.mrf.mxu0 }
 0x90e   : > { %v1197_v39 = vmul.f32 0.1, %v1922_v9  ;;  %v1261_v9 = vld [vmem:[%s2622_s28] sm:$0xff] }
 0x90f   : > { %v1138_v0 = vpop.f32.mrf.mxu0 }
 0x910   : > { %v1195_v26 = vmul.f32 0.1, %v1138_v0  ;;  %v1262_v0 = vld [vmem:[%s2622_s28 + $0x8] sm:$0xff] }
 0x911   : > { %v1923_v18 = vpop.f32.mrf.mxu0 }
 0x913   : > { %v1141_v12 = vpop.f32.mrf.mxu0 }
 0x914   : > { %v1196_v47 = vmul.f32 0.1, %v1141_v12  ;;  %v1273_v12 = vld [vmem:[%s2622_s28 + $0x60] sm:$0xff] }
 0x915   : > { %v1926_v24 = vpop.f32.mrf.mxu0 }
 0x916   : > { %v1201_v16 = vmul.f32 0.1, %v1926_v24  ;;  %v1274_v24 = vld [vmem:[%s2622_s28 + $0x68] sm:$0xff] }
 0x917   : > { %v1154_v2 = vpop.f32.mrf.mxu0 }
 0x918   : > { %v1199_v37 = vmul.f32 0.1, %v1154_v2  ;;  %v1283_v2 = vpack.c.bf16 %v1274_v24, %v1273_v12 }
 0x919   : > { %v1927_v32 = vpop.f32.mrf.mxu0 }
 0x91a   : > { %v1202_v31 = vmul.f32 0.1, %v1927_v32  ;;  %1966 = vmatprep.mubr.msk.bf16.mxu1 %vm579_vm1, %v1283_v2 }
 0x91b   : > { %v1157_v25 = vpop.f32.mrf.mxu0 }
 0x91c   : > { %v1218_v19 = vsub.f32 %v2510_v56, %v1202_v31  ;;  %v1200_v20 = vmul.f32 0.1, %v1157_v25  ;;  %v1266_v31 = vld [vmem:[%s2622_s28 + $0x28] sm:$0xff] }
 0x91d   : > { %v1930_v27 = vpop.f32.mrf.mxu0 }
 0x91e   : > { %v1205_v7 = vmul.f32 0.1, %v1930_v27 }
 0x91f   : > { %v1170_v33 = vpop.f32.mrf.mxu0 }
 0x920   : > { %v1221_v38 = vsub.f32 %v2495_v49, %v1205_v7  ;;  %v1203_v40 = vmul.f32 0.1, %v1170_v33  ;;  %v1217_v49 = vsub.f32 %v2515_v62, %v1201_v16  ;;  %v1213_v62 = vsub.f32 %v2533_v5, %v1197_v39 }
 0x921   : > { %v1931_v14 = vpop.f32.mrf.mxu0  ;;  %v1209_v5 = vsub.f32 %v2551_v41, %v1193_v50  ;;  %v1731_v41 = vld [vmem:[#allocation3] ss:$0 sm:$0xff] }
 0x922   : > { %v1206_v35 = vmul.f32 0.1, %v1931_v14  ;;  %v1219_v17 = vsub.f32 %v2506_v57, %v1203_v40  ;;  %v1291_v23 = vpack.c.bf16 %v1218_v19, %v1217_v49  ;;  %v1215_v57 = vsub.f32 %v2524_v1, %v1199_v37  ;;  %v1276_v40 = vld [vmem:[%s2622_s28 + $0x78] sm:$0xff]  ;;  %v1267_v37 = vld [vmem:[%s2622_s28 + $0x30] sm:$0xff] }
 0x923   : > { %v1173_v34 = vpop.f32.mrf.mxu0  ;;  %v1211_v1 = vsub.f32 %v2542_v10, %v1195_v26  ;;  %v1208_v10 = vsub.f32 %v2557_v42, %v1192_v52 }
 0x924   : > { %v1222_v44 = vsub.f32 %v2498_v51, %v1206_v35  ;;  %v1204_v28 = vmul.f32 0.1, %v1173_v34  ;;  %v1198_v51 = vmul.f32 0.1, %v1923_v18  ;;  %v1277_v18 = vpack.c.bf16 %v1262_v0, %v1261_v9  ;;  %v1263_v35 = vld [vmem:[%s2622_s28 + $0x10] sm:$0xff]  ;;  %v1264_v34 = vld [vmem:[%s2622_s28 + $0x18] sm:$0xff] }
 0x925   : > { %v1286_v46 = vpack.c.bf16 %v1208_v10, %v1207_v43  ;;  %v1278_v16 = vpack.c.bf16 %v1264_v34, %v1263_v35 }
 0x926   : > { %v1293_v11 = vpack.c.bf16 %v1222_v44, %v1221_v38  ;;  %v1220_v45 = vsub.f32 %v2503_v55, %v1204_v28  ;;  %v1216_v55 = vsub.f32 %v2521_v6, %v1200_v20  ;;  %v1214_v56 = vsub.f32 %v2528_v21, %v1198_v51  ;;  %v1275_v38 = vld [vmem:[%s2622_s28 + $0x70] sm:$0xff]  ;;  %v1265_v28 = vld [vmem:[%s2622_s28 + $0x20] sm:$0xff]  ;;  %v1268_v51 = vld [vmem:[%s2622_s28 + $0x38] sm:$0xff] }
 0x927   : > { %v1212_v6 = vsub.f32 %v2539_v8, %v1196_v47  ;;  %v1210_v21 = vsub.f32 %v2546_v30, %v1194_v48  ;;  %v1259_v30 = vld [vmem:[%s449_s11] sm:$0xff]  ;;  %s458_s11 = scalar_lea.vmem %s2716_s5, %s2297_s12  ;;  %v1279_v20 = vpack.c.bf16 %v1266_v31, %v1265_v28  ;;  %s431_s12 = sand.u32 1, %s2086_s14  }
 0x928   : > { %1933 = vmatpush3.bf16.msra.mxu0 %v1293_v11  ;;  %v1292_v36 = vpack.c.bf16 %v1220_v45, %v1219_v17  ;;  %v1290_v22 = vpack.c.bf16 %v1216_v55, %v1215_v57  ;;  %v1289_v29 = vpack.c.bf16 %v1214_v56, %v1213_v62  ;;  %v1260_v60 = vpack.c.bf16 %v1259_v30, %v1259_v30  ;;  %v1285_v27 = vld [vmem:[%s458_s11] sm:$0xff]  ;;  %v1270_v55 = vld [vmem:[%s2622_s28 + $0x48] sm:$0xff]  ;;  %s432_s20 = scalar_lea.vmem [#allocation4], %s431_s12  ;;  %v1272_v62 = vld [vmem:[%s2622_s28 + $0x58] sm:$0xff]  ;;  %s1510_s30 = scalar_lea.sflag [#allocation5], %s431_s12 }
 0x929   : > { %1934 = vmatprep.subr.bf16.mxu0 %v2096_v3  ;;  %v1288_v53 = vpack.c.bf16 %v1212_v6, %v1211_v1  ;;  %v1287_v8 = vpack.c.bf16 %v1210_v21, %v1209_v5  ;;  %v1284_v17 = vpack.c.bf16 %v1276_v40, %v1275_v38  ;;  %v1280_v57 = vpack.c.bf16 %v1268_v51, %v1267_v37 }
 0x92c   : > { %1935 = vmatpush3.bf16.msra.mxu0 %v1292_v36 }
 0x92d   : > { %1936 = vmatprep.subr.bf16.mxu0 %v2096_v3 }
 0x930   : > { %1937 = vmatpush3.bf16.msra.mxu0 %v1291_v23  ;;  %v1269_v23 = vld [vmem:[%s2622_s28 + $0x40] sm:$0xff] }
 0x931   : > { %1938 = vmatprep.subr.bf16.mxu0 %v2096_v3  ;;  %v1281_v47 = vpack.c.bf16 %v1270_v55, %v1269_v23 }
 0x934   : > { %1939 = vmatpush3.bf16.msra.mxu0 %v1290_v22  ;;  %v1271_v22 = vld [vmem:[%s2622_s28 + $0x50] sm:$0xff]  ;;  %s2040_s28 = scalar_lea.vmem %s2039_s1, 32 }
 0x935   : > { %1940 = vmatprep.subr.bf16.mxu0 %v2096_v3  ;;  %v1282_v26 = vpack.c.bf16 %v1272_v62, %v1271_v22 }
 0x938   : > { %1941 = vmatpush3.bf16.msra.mxu0 %v1289_v29 }
 0x939   : > { %1942 = vmatprep.subr.bf16.mxu0 %v2096_v3 }
 0x93c   : > { %1943 = vmatpush3.bf16.msra.mxu0 %v1288_v53 }
 0x93d   : > { %1944 = vmatprep.subr.bf16.mxu0 %v2096_v3 }
 0x940   : > { %1945 = vmatpush3.bf16.msra.mxu0 %v1287_v8 }
 0x941   : > { %1946 = vmatprep.subr.bf16.mxu0 %v2096_v3 }
 0x944   : > { %1947 = vmatpush3.bf16.msra.mxu0 %v1286_v46 }
 0x947   : > { %1949 = vmatmul.mubr.bf16.vlgmr.msra.gmra.mxu0 %v1260_v60 }
 0x948   : > { %1954 = vmatprep.mubr.msk.bf16.mxu0 %vm579_vm1, %v1277_v18 }
 0xa07   : > { %v1334_v61 = vpop.f32.mrf.mxu0 }
 0xa08   : > { %v1335_v63 = vadd.f32 %v1731_v41, %v1334_v61 }
 0xa09   : > { %v1950_v58 = vpop.f32.mrf.mxu0 }
 0xa0a   : > { %1482 = vst [vmem:[%s462_s25] sm:$0xff] %v1335_v63  ;;  %1340 = vmax.xlane.f32.xlu0 %v1335_v63  ;;  %s1528_s25 = sshll.u32 %s432_s20, 4  ;;  %s1529_s25 = int_to_ptr.vmem [resolvable:$true] %s1528_s25 }
 0xa0b   : > { %v1337_v42 = vpop.f32.mrf.mxu0  ;;  %s2034_s11 = scalar_lea.vmem %s1529_s25, 16  ;;  %p2041_p0 = scmp.lt.s32.totalorder %s1529_s25, %s2039_s1 }
 0xa0c   : > { %p2035_p11 = scmp.ne.s32.totalorder %s1529_s25, %s2034_s11  ;;  %p2042_p1 = scmp.lt.s32.totalorder %s2040_s28, %s2034_s11 }
 0xa0d   : > { %v1951_v13 = vpop.f32.mrf.mxu0 }
 0xa0e   : > { %p2036_p12 = pnand %p2035_p11, %p2192_p5  ;;  %p2043_p2 = por %p2042_p1, %p2041_p0 }
 0xa10   : > { %p2037_p13 = pneg %p2036_p12 }
 0xa12   : > { %p2044_p3 = pnand %p2043_p2, %p2037_p13 }
 0xa93   : > { %v1341_v59 = vpop.xlane.xlu0 %1340 }
 0xa94   : > { %v1342_v4 = vsub.f32 %v1335_v63, %v1341_v59 }
 0xa96   : > { %v1343_v3 = vmul.f32 1.442695, %v1342_v4 }
 0xa98   : > { %2030 = vpow2.f32 %v1343_v3 }
 0xaa5   : > { %v2031_v15 = vpop.eup %2030 }
 0xaa6   : > { %1345 = vadd.xlane.f32.xlu1 %v2031_v15 }
 0xb2f   : > { %v1346_v32 = vpop.xlane.xlu1 %1345 }
 0xb30   : > { %2032 = vrcp.f32 %v1346_v32 }
 0xb3d   : > { %v2033_v25 = vpop.eup %2032 }
 0xb3e   : > { %v1348_v33 = vmul.f32 %v2033_v25, %v2031_v15 }
 0xb40   : > { %v1349_v7 = vsub.f32 %v1348_v33, %v1285_v27 }
 0xb42   : > { %v1350_v14 = vmul.f32 0.125, %v1349_v7 }
 0xb44   : > { %v1351_v44 = vpack.c.bf16 %v1350_v14, %v1350_v14  ;;  %v1476_v11 = vrot.slane %v1350_v14, 4 }
 0xb46   : > { %1975 = vmatprep.subr.msk.bf16.mxu0 %vm604_vm2, %v1351_v44  ;;  %1976 = vmatprep.subr.msk.bf16.mxu1 %vm604_vm2, %v1351_v44  ;;  %v1377_v45 = vsel %vm604_vm2, %v1351_v44, 0  ;;  %v1477_v19 = vadd.f32 %v1476_v11, %v1350_v14 }
 0xb47   : > { %1953 = vmatpush3.bf16.msra.mxu0 %v1377_v45  ;;  %1971 = vmatpush3.bf16.msra.mxu1 %v1377_v45 }
 0xb48   : > { %v1478_v36 = vrot.slane %v1477_v19, 2 }
 0xb4a   : > { %1955 = vmatmul.mubr.msk.bf16.vlgmr.msra.gmra.mxu0 %vm579_vm1, %v1278_v16  ;;  %1967 = vmatmul.mubr.msk.bf16.vlgmr.msra.gmra.mxu1 %vm579_vm1, %v1284_v17  ;;  %v1479_v49 = vadd.f32 %v1478_v36, %v1477_v19 }
 0xb4b   : > { %1958 = vmatprep.mubr.msk.bf16.mxu0 %vm579_vm1, %v1279_v20 }
 0xb4c   : > { %v1480_v39 = vrot.slane %v1479_v49, 1 }
 0xb4e   : > { %v1481_v56 = vadd.f32 %v1480_v39, %v1479_v49 }
 0xb50   : > { %1499 = vst [vmem:[%s432_s20] sm:$0x1] %v1481_v56 }
 0xb52   : > { %1959 = vmatmul.mubr.msk.bf16.gmra.mxu0 %vm579_vm1, %v1280_v57 }
 0xb53   : > { %1962 = vmatprep.mubr.msk.bf16.mxu0 %vm579_vm1, %v1281_v47 }
 0xb5a   : > { %1963 = vmatmul.mubr.msk.bf16.gmra.mxu0 %vm579_vm1, %v1282_v26 }
 0xb5b   : > { %2047 = shalt.err (!%p2044_p3)
}
 0xb5c   : > { %s2048_s17 = scalar_lea.hbm %s1526_s29, 16  ;;  %s2052_s21 = scalar_lea.hbm %s2721_s10, 64 }
 0xb5d   : > { %p2049_p4 = scmp.ne.s32.totalorder %s1526_s29, %s2048_s17  ;;  %p2053_p9 = scmp.lt.s32.totalorder %s1526_s29, %s2721_s10 }
 0xb5e   : > { %p2054_p10 = scmp.lt.s32.totalorder %s2052_s21, %s2048_s17 }
 0xb5f   : > { %p2050_p7 = pnand %p2049_p4, %p2192_p5 }
 0xb60   : > { %p2055_p11 = por %p2054_p10, %p2053_p9 }
 0xb61   : > { %p2051_p8 = pneg %p2050_p7 }
 0xb63   : > { %p2056_p12 = pnand %p2055_p11, %p2051_p8 }
 0xb65   : > { %2059 = shalt.err (!%p2056_p12)
}
 0xb66   : > { %1977 = dma.vmem_to_hbm [thread:$0]  (%p2192_p5), %s1529_s25, 16, %s1526_s29, %s1510_s30  }
 0xb67   : > { %s2676_s11 = scalar_lea.vmem %s2720_s9, %s2329_s18 }
 0xc0a   : > { %v1956_v48 = vpop.f32.mrf.mxu0  ;;  %v1968_v29 = vpop.f32.mrf.mxu1 }
 0xc0b   : > { %1485 = vst [vmem:[%s2676_s11 + $0x10] sm:$0xff] %v1956_v48  ;;  %1497 = vst [vmem:[%s2676_s11 + $0x70] sm:$0xff] %v1968_v29 }
 0xc0c   : > { %v1413_v6 = vpop.f32.mrf.mxu0  ;;  %v1461_v50 = vpop.f32.mrf.mxu1 }
 0xc0d   : > { %1483 = vst [vmem:[%s2676_s11] sm:$0xff] %v1413_v6  ;;  %1495 = vst [vmem:[%s2676_s11 + $0x60] sm:$0xff] %v1461_v50 }
 0xc0e   : > { %v1957_v1 = vpop.f32.mrf.mxu0  ;;  %v1969_v21 = vpop.f32.mrf.mxu1 }
 0xc0f   : > { %1486 = vst [vmem:[%s2676_s11 + $0x18] sm:$0xff] %v1957_v1  ;;  %1498 = vst [vmem:[%s2676_s11 + $0x78] sm:$0xff] %v1969_v21 }
 0xc10   : > { %v1416_v52 = vpop.f32.mrf.mxu0  ;;  %v1464_v53 = vpop.f32.mrf.mxu1 }
 0xc11   : > { %1484 = vst [vmem:[%s2676_s11 + $0x8] sm:$0xff] %v1416_v52  ;;  %1496 = vst [vmem:[%s2676_s11 + $0x68] sm:$0xff] %v1464_v53 }
 0xc12   : > { %v1960_v5 = vpop.f32.mrf.mxu0 }
 0xc13   : > { %1489 = vst [vmem:[%s2676_s11 + $0x30] sm:$0xff] %v1960_v5 }
 0xc14   : > { %v1429_v54 = vpop.f32.mrf.mxu0 }
 0xc15   : > { %1487 = vst [vmem:[%s2676_s11 + $0x20] sm:$0xff] %v1429_v54 }
 0xc16   : > { %v1961_v8 = vpop.f32.mrf.mxu0 }
 0xc17   : > { %1490 = vst [vmem:[%s2676_s11 + $0x38] sm:$0xff] %v1961_v8 }
 0xc18   : > { %v1432_v10 = vpop.f32.mrf.mxu0 }
 0xc19   : > { %1488 = vst [vmem:[%s2676_s11 + $0x28] sm:$0xff] %v1432_v10 }
 0xc1a   : > { %v1964_v43 = vpop.f32.mrf.mxu0 }
 0xc1b   : > { %1493 = vst [vmem:[%s2676_s11 + $0x50] sm:$0xff] %v1964_v43 }
 0xc1c   : > { %v1445_v30 = vpop.f32.mrf.mxu0 }
 0xc1d   : > { %1491 = vst [vmem:[%s2676_s11 + $0x40] sm:$0xff] %v1445_v30 }
 0xc1e   : > { %v1965_v46 = vpop.f32.mrf.mxu0 }
 0xc1f   : > { %1494 = vst [vmem:[%s2676_s11 + $0x58] sm:$0xff] %v1965_v46 }
 0xc20   : > { %v1448_v60 = vpop.f32.mrf.mxu0 }
 0xc21   : > { %1492 = vst [vmem:[%s2676_s11 + $0x48] sm:$0xff] %v1448_v60 }
 0xc22 PF: > { %p1983_p5 = scmp.ge.s32.totalorder %s2094_s16, 2  ;;  %s1555_s23 = sand.u32 1, %s2082_s13  }
 0xc23   : > { %s1556_s18 = scalar_lea.sflag [#allocation5], %s1555_s23 }
 0xc24   : > { %p1980_p13 = pnand %p1983_p5, %p2196_p6 }
 0xc26   : > { %p1981_p0 = pneg %p1980_p13 }
 0xc28   : > { %2077 = dma.done.wait (%p1981_p0), %s1556_s18, 16  }
 0xc29   : > { %2079 = vsyncadd (%p1981_p0), %s1556_s18, 4294967280  ;;  %p21_p1 = scmp.ge.s32.totalorder %s2179_s19, 6   ;;  %s2728_s13 = smov %s2086_s14 }
 0xc2a   : > { %s2729_s14 = smov %s2090_s15  ;;  %s2730_s15 = smov %s2190_s22 }
 0xc2b   : > { %s2731_s16 = smov %s2179_s19  ;;  %23 = sbr.rel (!%p21_p1) target bundleno = 6 (0x6), region = 126 }
 0xc30   :  { %1560 = vsyncpa [#allocation5], 1 }
 0xc31   :  { %1562 = vsyncpa [#allocation5 + $0x1], 1 }

</bundles_post_ra>
